<compile_context>
chip_gen: v7x
topology: tpu7x:2x2x1
jax: 0.10.0
libtpu: 0.0.40
codegen_flags: <defaults>
</compile_context>

<pallas_src>
import functools

import jax
import jax.numpy as jnp
from jax import lax
from jax.experimental import pallas as pl
from jax.experimental.pallas import tpu as pltpu

_LANE = 128
_SUBLANE = 8
# Per-step VMEM sizing budget: input pipeline buffers + f32 body temporaries.
# Keeps total declared VMEM well under v7x's 64 MiB physical while giving every
# generation a ~8 MiB aggregate HBM payload per grid step.
_VMEM_SIZING_BUDGET = 40 * 1024 * 1024
_F32_TEMPS_PER_ELEM = 4     # diff / |diff| / diff^2 / upcasts (conservative)
_INPUT_BUFFERS = 3          # pl.Buffered(3) on the two inputs


def _recon_sums_kernel(x_ref, y_ref, out_ref, *, c_total, c_tile,
                       chunks_per_split, need_mask):
    """Per-row sum|x-y| and sum (x-y)^2, accumulated across feature chunks.

    x_ref / y_ref : (m_tile, c_tile) input blocks (native dtype, upcast here).
    out_ref       : (1, m_tile, 2) f32 block, resident across the chunk axis
                    (same block index for every k) -> accumulator in VMEM.
    """
    c_idx = pl.program_id(1)      # core-split index (v7x megacore helper)
    k = pl.program_id(2)          # feature-chunk index (reduction axis)

    d = x_ref[...].astype(jnp.float32) - y_ref[...].astype(jnp.float32)

    if need_mask:                 # static: only traced when a ragged tail exists
        chunk_id = c_idx * chunks_per_split + k
        limit = c_total - chunk_id * c_tile       # <= 0 for phantom chunks
        col = lax.broadcasted_iota(jnp.int32, d.shape, 1)
        # Zero garbage (possibly NaN/Inf) BEFORE abs/square so sums stay clean.
        d = jnp.where(col < limit, d, 0.0)

    l1 = jnp.sum(jnp.abs(d), axis=1, keepdims=True)   # (m_tile, 1)
    l2 = jnp.sum(d * d, axis=1, keepdims=True)        # (m_tile, 1)

    @pl.when(k == 0)
    def _first():                 # first chunk: plain store (no init pass, no RMW)
        out_ref[0, :, 0:1] = l1
        out_ref[0, :, 1:2] = l2

    @pl.when(k > 0)
    def _accumulate():
        out_ref[0, :, 0:1] = out_ref[0, :, 0:1] + l1
        out_ref[0, :, 1:2] = out_ref[0, :, 1:2] + l2


def _choose_rows_per_sample(n, d):
    """Pick R (feature rows per sample) so M = N*R fills the 8 sublanes even
    for tiny batches, preferring 128-lane-aligned row widths.  Free reshape."""
    if n >= _SUBLANE or d <= 1:
        return 1
    r_min = -(-_SUBLANE // n)                     # ceil(8 / N)
    limit = min(max(r_min * 64, _SUBLANE), d)
    for cand in range(r_min, limit + 1):          # prefer lane-aligned rows
        if d % cand == 0 and (d // cand) % _LANE == 0:
            return cand
    for cand in range(r_min, limit + 1):          # fall back: any clean split
        if d % cand == 0 and (d // cand) >= _LANE:
            return cand
    return 1


@jax.jit
def aggregated_reconstruction_loss(input_nchw, target_nchw):
    """JAX/Pallas equivalent of AggregatedReconstructionLossWithFeatures.forward.

    Returns (aggregated_loss with shape (1,), features dict).
    """
    n, ch, h, w = input_nchw.shape
    d = ch * h * w

    # ---- free re-layout (never jnp.pad, never a copy) ----------------------
    rows_per_sample = _choose_rows_per_sample(n, d)
    m = n * rows_per_sample
    c_cols = d // rows_per_sample
    x2 = input_nchw.reshape(m, c_cols)
    y2 = target_nchw.reshape(m, c_cols)

    # ---- block sizing (budget counts pipeline buffers + f32 temporaries) ---
    itemsize = jnp.dtype(input_nchw.dtype).itemsize
    per_elem_bytes = 2 * _INPUT_BUFFERS * itemsize + _F32_TEMPS_PER_ELEM * 4
    max_block_elems = max(_VMEM_SIZING_BUDGET // per_elem_bytes,
                          _SUBLANE * _LANE)

    m_base = m if m < _SUBLANE else _SUBLANE
    m_base_pad = -(-m_base // _SUBLANE) * _SUBLANE
    c_cap = max((max_block_elems // m_base_pad) // _LANE * _LANE, _LANE)

    if c_cols <= c_cap:
        # Whole feature row per chunk; pack many rows (= samples) per block so
        # small-D workloads are not per-step-overhead bound.
        c_tile = c_cols
        num_chunks = 1
        c_pad = -(-c_tile // _LANE) * _LANE
        m_want = max(int(max_block_elems // c_pad), 1)
        if m_want >= m or m <= _SUBLANE:
            m_tile = m
        else:
            m_tile = min(m, max(_SUBLANE, (m_want // _SUBLANE) * _SUBLANE))
    else:
        # Chunk the feature dim with lane-aligned chunks.
        c_tile = c_cap
        num_chunks = -(-c_cols // c_tile)
        m_tile = m_base

    n_blocks = -(-m // m_tile)

    # If the whole problem is one large block, split the feature axis in two so
    # v7x's two TensorCores each take half (harmless on single-core chips).
    if (n_blocks == 1 and num_chunks == 1 and c_tile >= 2 * _LANE
            and m * c_cols * itemsize >= (1 << 20)):
        half = -(-c_cols // 2)
        c_tile = -(-half // _LANE) * _LANE
        num_chunks = -(-c_cols // c_tile)

    split = 2 if (n_blocks == 1 and num_chunks >= 2) else 1
    chunks_per_split = -(-num_chunks // split)
    need_mask = (split * chunks_per_split * c_tile) != c_cols

    # ---- VMEM limit: input buffers + f32 temporaries + outputs + slack -----
    m_pad = -(-m_tile // _SUBLANE) * _SUBLANE
    c_pad = -(-c_tile // _LANE) * _LANE
    block_elems_pad = m_pad * c_pad
    vmem_needed = (2 * _INPUT_BUFFERS * block_elems_pad * itemsize
                   + _F32_TEMPS_PER_ELEM * block_elems_pad * 4
                   + 2 * m_pad * _LANE * 4
                   + (2 << 20))
    vmem_limit = int(min(max(vmem_needed, 16 * 1024 * 1024),
                         48 * 1024 * 1024))

    # ---- pallas_call --------------------------------------------------------
    if split * chunks_per_split > num_chunks:
        # Phantom trailing chunks possible (odd chunk count + core split):
        # clamp the DMA window; the kernel mask zeroes their contribution.
        def in_idx(i, c, k):
            return (i, jnp.minimum(c * chunks_per_split + k, num_chunks - 1))
    else:
        def in_idx(i, c, k):
            return (i, c * chunks_per_split + k)

    total_steps = n_blocks * split * chunks_per_split

    def _make_in_spec():
        if total_steps >= _INPUT_BUFFERS:
            return pl.BlockSpec((m_tile, c_tile), in_idx,
                                pipeline_mode=pl.Buffered(_INPUT_BUFFERS))
        return pl.BlockSpec((m_tile, c_tile), in_idx)

    out_spec = pl.BlockSpec((1, m_tile, 2), lambda i, c, k: (c, i, 0))

    kernel = functools.partial(
        _recon_sums_kernel,
        c_total=c_cols, c_tile=c_tile,
        chunks_per_split=chunks_per_split, need_mask=need_mask)

    row_sums = pl.pallas_call(
        kernel,
        out_shape=jax.ShapeDtypeStruct((split, m, 2), jnp.float32),
        grid_spec=pltpu.PrefetchScalarGridSpec(
            num_scalar_prefetch=0,
            grid=(n_blocks, split, chunks_per_split),
            in_specs=[_make_in_spec(), _make_in_spec()],
            out_specs=out_spec,
        ),
        compiler_params=pltpu.CompilerParams(
            dimension_semantics=("parallel", "parallel", "arbitrary"),
            vmem_limit_bytes=vmem_limit,
        ),
    )(x2, y2)

    # ---- tiny plain-JAX epilogue (N*2 floats) -------------------------------
    per_row = jnp.sum(row_sums, axis=0)                               # (M, 2)
    per_sample = per_row.reshape(n, rows_per_sample, 2).sum(axis=1)   # (N, 2)
    inv_d = 1.0 / float(d)
    l1_per_sample = per_sample[:, 0] * inv_d
    l2_per_sample = per_sample[:, 1] * inv_d

    # Sub-loss 1: L1 reconstruction loss + per-sample features.
    loss_l1 = jnp.mean(l1_per_sample)
    feats_l1 = {"l1_per_sample": l1_per_sample}
    # Sub-loss 2: L2/MSE reconstruction loss + per-sample features.
    loss_l2 = jnp.mean(l2_per_sample)
    feats_l2 = {"l2_per_sample": l2_per_sample}

    # Aggregation exactly as in the PyTorch module:
    #   aggregated_loss = input.new_zeros(1); aggregated_loss += loss_i
    #   aggregated_features.update(features_i)
    aggregated_loss_f32 = jnp.zeros((1,), dtype=jnp.float32)
    aggregated_features = {}
    for loss, feats in ((loss_l1, feats_l1), (loss_l2, feats_l2)):
        aggregated_loss_f32 = aggregated_loss_f32 + loss
        aggregated_features.update(feats)
    aggregated_loss = aggregated_loss_f32.astype(input_nchw.dtype)

    return aggregated_loss, aggregated_features


if __name__ == "__main__":
    key = jax.random.PRNGKey(0)
    k_in, k_tgt = jax.random.split(key)

    # NCHW, small shapes: batch=2, channels=4, spatial=16x16.
    input_nchw = jax.random.normal(k_in, (2, 4, 16, 16), dtype=jnp.float32)
    target_nchw = jax.random.normal(k_tgt, (2, 4, 16, 16), dtype=jnp.float32)

    loss, features = aggregated_reconstruction_loss(input_nchw, target_nchw)
    loss = jax.block_until_ready(loss)
    features = jax.tree_util.tree_map(jax.block_until_ready, features)

    # Sanity check against a pure-JAX reference.
    diff = input_nchw - target_nchw
    ref_loss = jnp.abs(diff).mean() + (diff * diff).mean()
    assert jnp.allclose(loss[0], ref_loss, rtol=1e-5, atol=1e-5), (loss, ref_loss)
    ref_l1 = jnp.abs(diff).reshape(2, -1).mean(axis=1)
    ref_l2 = (diff * diff).reshape(2, -1).mean(axis=1)
    assert jnp.allclose(features["l1_per_sample"], ref_l1, rtol=1e-5, atol=1e-5)
    assert jnp.allclose(features["l2_per_sample"], ref_l2, rtol=1e-5, atol=1e-5)
    assert loss.shape == (1,)
    assert set(features.keys()) == {"l1_per_sample", "l2_per_sample"}

    print("KERNEL_OK")
</pallas_src>

<mosaic_0001>
module attributes {stable_mosaic.version = 11 : i64} {
  func.func @_recon_sums_kernel(%arg0: i32, %arg1: i32, %arg2: i32, %arg3: memref<8x256xf32, #tpu.memory_space<vmem>>, %arg4: memref<8x256xf32, #tpu.memory_space<vmem>>, %arg5: memref<1x8x2xf32, #tpu.memory_space<vmem>>) attributes {dimension_semantics = [#tpu.dimension_semantics<parallel>, #tpu.dimension_semantics<parallel>, #tpu.dimension_semantics<arbitrary>], iteration_bounds = array<i64: 1, 1, 1>, scalar_prefetch = 0 : i64, scratch_operands = 0 : i64, tpu.core_type = #tpu.core_type<tc>, window_params = [{transform_indices = @transform_0, window_bounds = array<i64: 8, 256>}, {transform_indices = @transform_1, window_bounds = array<i64: 8, 256>}, {transform_indices = @transform_2, window_bounds = array<i64: 1, 8, 2>}]} {
    %c0 = arith.constant 0 : index
    %c0_0 = arith.constant 0 : index
    %0 = vector.load %arg3[%c0, %c0_0] : memref<8x256xf32, #tpu.memory_space<vmem>>, vector<8x256xf32>
    %c0_1 = arith.constant 0 : index
    %c0_2 = arith.constant 0 : index
    %1 = vector.load %arg4[%c0_1, %c0_2] : memref<8x256xf32, #tpu.memory_space<vmem>>, vector<8x256xf32>
    %2 = arith.subf %0, %1 : vector<8x256xf32>
    %3 = math.absf %2 : vector<8x256xf32>
    %cst = arith.constant dense<0.000000e+00> : vector<8xf32>
    %4 = vector.multi_reduction <add>, %3, %cst [1] : vector<8x256xf32> to vector<8xf32>
    %5 = vector.shape_cast %4 : vector<8xf32> to vector<8x1xf32>
    %6 = arith.mulf %2, %2 : vector<8x256xf32>
    %cst_3 = arith.constant dense<0.000000e+00> : vector<8xf32>
    %7 = vector.multi_reduction <add>, %6, %cst_3 [1] : vector<8x256xf32> to vector<8xf32>
    %8 = vector.shape_cast %7 : vector<8xf32> to vector<8x1xf32>
    %c0_i32 = arith.constant 0 : i32
    %9 = arith.cmpi eq, %arg2, %c0_i32 : i32
    %10 = arith.extui %9 : i1 to i32
    %c0_i32_4 = arith.constant 0 : i32
    %11 = arith.cmpi ne, %10, %c0_i32_4 : i32
    scf.if %11 {
      %c0_7 = arith.constant 0 : index
      %c0_8 = arith.constant 0 : index
      %c0_9 = arith.constant 0 : index
      %15 = vector.load %arg5[%c0_7, %c0_8, %c0_9] : memref<1x8x2xf32, #tpu.memory_space<vmem>>, vector<1x8x1xf32>
      %16 = vector.shape_cast %15 : vector<1x8x1xf32> to vector<8x1xf32>
      %17 = vector.shape_cast %5 : vector<8x1xf32> to vector<1x8x1xf32>
      tpu.vector_store %arg5[%c0_7, %c0_8, %c0_9], %17 {strides = array<i32>} : memref<1x8x2xf32, #tpu.memory_space<vmem>>, vector<1x8x1xf32>,
      %c0_10 = arith.constant 0 : index
      %c0_11 = arith.constant 0 : index
      %c1 = arith.constant 1 : index
      %18 = vector.load %arg5[%c0_10, %c0_11, %c1] : memref<1x8x2xf32, #tpu.memory_space<vmem>>, vector<1x8x1xf32>
      %19 = vector.shape_cast %18 : vector<1x8x1xf32> to vector<8x1xf32>
      %20 = vector.shape_cast %8 : vector<8x1xf32> to vector<1x8x1xf32>
      tpu.vector_store %arg5[%c0_10, %c0_11, %c1], %20 {strides = array<i32>} : memref<1x8x2xf32, #tpu.memory_space<vmem>>, vector<1x8x1xf32>,
    } else {
    }
    %c0_i32_5 = arith.constant 0 : i32
    %12 = arith.cmpi sgt, %arg2, %c0_i32_5 : i32
    %13 = arith.extui %12 : i1 to i32
    %c0_i32_6 = arith.constant 0 : i32
    %14 = arith.cmpi ne, %13, %c0_i32_6 : i32
    scf.if %14 {
      %c0_7 = arith.constant 0 : index
      %c0_8 = arith.constant 0 : index
      %c0_9 = arith.constant 0 : index
      %15 = vector.load %arg5[%c0_7, %c0_8, %c0_9] : memref<1x8x2xf32, #tpu.memory_space<vmem>>, vector<1x8x1xf32>
      %16 = vector.shape_cast %15 : vector<1x8x1xf32> to vector<8x1xf32>
      %17 = arith.addf %16, %5 : vector<8x1xf32>
      %c0_10 = arith.constant 0 : index
      %c0_11 = arith.constant 0 : index
      %c0_12 = arith.constant 0 : index
      %18 = vector.load %arg5[%c0_10, %c0_11, %c0_12] : memref<1x8x2xf32, #tpu.memory_space<vmem>>, vector<1x8x1xf32>
      %19 = vector.shape_cast %18 : vector<1x8x1xf32> to vector<8x1xf32>
      %20 = vector.shape_cast %17 : vector<8x1xf32> to vector<1x8x1xf32>
      tpu.vector_store %arg5[%c0_10, %c0_11, %c0_12], %20 {strides = array<i32>} : memref<1x8x2xf32, #tpu.memory_space<vmem>>, vector<1x8x1xf32>,
      %c0_13 = arith.constant 0 : index
      %c0_14 = arith.constant 0 : index
      %c1 = arith.constant 1 : index
      %21 = vector.load %arg5[%c0_13, %c0_14, %c1] : memref<1x8x2xf32, #tpu.memory_space<vmem>>, vector<1x8x1xf32>
      %22 = vector.shape_cast %21 : vector<1x8x1xf32> to vector<8x1xf32>
      %23 = arith.addf %22, %8 : vector<8x1xf32>
      %c0_15 = arith.constant 0 : index
      %c0_16 = arith.constant 0 : index
      %c1_17 = arith.constant 1 : index
      %24 = vector.load %arg5[%c0_15, %c0_16, %c1_17] : memref<1x8x2xf32, #tpu.memory_space<vmem>>, vector<1x8x1xf32>
      %25 = vector.shape_cast %24 : vector<1x8x1xf32> to vector<8x1xf32>
      %26 = vector.shape_cast %23 : vector<8x1xf32> to vector<1x8x1xf32>
      tpu.vector_store %arg5[%c0_15, %c0_16, %c1_17], %26 {strides = array<i32>} : memref<1x8x2xf32, #tpu.memory_space<vmem>>, vector<1x8x1xf32>,
    } else {
    }
    return
  }
  func.func @transform_0(%arg0: i32, %arg1: i32, %arg2: i32) -> (i32, i32) {
    %c1_i32 = arith.constant 1 : i32
    %0 = arith.muli %arg1, %c1_i32 : i32
    %1 = arith.addi %0, %arg2 : i32
    %c0_i32 = arith.constant 0 : i32
    return %arg0, %1 : i32, i32
  }
  func.func @transform_1(%arg0: i32, %arg1: i32, %arg2: i32) -> (i32, i32) {
    %c1_i32 = arith.constant 1 : i32
    %0 = arith.muli %arg1, %c1_i32 : i32
    %1 = arith.addi %0, %arg2 : i32
    %c0_i32 = arith.constant 0 : i32
    return %arg0, %1 : i32, i32
  }
  func.func @transform_2(%arg0: i32, %arg1: i32, %arg2: i32) -> (i32, i32, i32) {
    %c0_i32 = arith.constant 0 : i32
    %c0_i32_0 = arith.constant 0 : i32
    return %arg1, %arg0, %c0_i32 : i32, i32, i32
  }
}

</mosaic_0001>

<bundles_post_ra>
// kernel: aggregated_reconstruction_loss.1
= control target key start
LH: loop header
LB: loop body
LE: loop exit
PB: predicated region body
PF: predicated region fallthrough
CT: control target
= control target key end

     0   :  { %vm75_vm0 = vcmask 7168   ;;  %vm77_vm1 = vcmask 15368   ;;  %s140_s0 = inlined_call_operand.vmem [shape: f32[8,256], index: 0, kind: input, shape index: {}]   ;;  %s141_s1 = inlined_call_operand.vmem [shape: f32[8,256], index: 1, kind: input, shape index: {}]   ;;  %s142_s2 = inlined_call_operand.vmem [shape: f32[1,8,2], index: 2, kind: output, shape index: {}]  }
   0x1   :  { %v55_v0 = vld [vmem:[%s140_s0] sm:$0xff]  ;;  %v56_v1 = vld [vmem:[%s140_s0 + $0x8] sm:$0xff] }
   0x2   :  { %v57_v2 = vld [vmem:[%s141_s1] sm:$0xff]  ;;  %v58_v3 = vld [vmem:[%s141_s1 + $0x8] sm:$0xff] }
   0x3   :  { %v59_v4 = vsub.f32 %v55_v0, %v57_v2  ;;  %v60_v5 = vsub.f32 %v56_v1, %v58_v3 }
   0x5   :  { %v61_v6 = vand.u32 2147483647, %v59_v4  ;;  %v62_v7 = vand.u32 2147483647, %v60_v5  ;;  %v66_v8 = vmul.f32 %v59_v4, %v59_v4  ;;  %v67_v9 = vmul.f32 %v60_v5, %v60_v5 }
   0x7   :  { %v63_v10 = vadd.f32 %v62_v7, %v61_v6  ;;  %v68_v11 = vadd.f32 %v67_v9, %v66_v8 }
   0x9   :  { %64 = vadd.xlane.f32.xlu0 %v63_v10 }
   0xd   :  { %69 = vadd.xlane.f32.xlu0 %v68_v11 }
  0x96   :  { %v65_v12 = vpop.xlane.xlu0 %64 }
  0x97   :  { %76 = vst.msk [vmem:[%s142_s2] sm:$0xff] %vm75_vm0, %v65_v12 }
  0x9a   :  { %v70_v13 = vpop.xlane.xlu0 %69 }
  0x9b   :  { %78 = vst.msk [vmem:[%s142_s2] sm:$0xff] %vm77_vm1, %v70_v13 }

</bundles_post_ra>
